<compile_context>
chip_gen: v7x
topology: tpu7x:2x2x1
jax: 0.10.0
libtpu: 0.0.40
codegen_flags: <defaults>
</compile_context>

<pallas_src>
import functools

import jax
import jax.numpy as jnp
from jax.experimental import pallas as pl
from jax.experimental.pallas import tpu as pltpu


def _cdiv(a: int, b: int) -> int:
    return (a + b - 1) // b


def _round_up(a: int, b: int) -> int:
    return _cdiv(a, b) * b


def _vmem_capacity_bytes() -> int:
    try:
        cap = getattr(pltpu.get_tpu_info(), "vmem_capacity_bytes", None)
        if cap:
            return int(cap)
    except Exception:
        pass
    return 64 * 1024 * 1024  # conservative (v7x per-TensorCore)


def _fwg_kernel_single(x_ref, w_ref, o_ref, *, th, w_len):
    # Single-tile variant (TH == H): no halo needed.
    od = o_ref.dtype
    x = x_ref[...].astype(jnp.float32)        # (TH, W)
    w0 = w_ref[0].astype(jnp.float32)
    w1 = w_ref[1].astype(jnp.float32)

    # d/dx: forward diff along W; last column is zero.
    if w_len > 1:
        o_ref[0, :, 0 : w_len - 1] = ((x[:, 1:] - x[:, :-1]) * w0[:, :-1]).astype(od)
    o_ref[0, :, w_len - 1 : w_len] = jnp.zeros((th, 1), od)

    # d/dy: forward diff along H; last row is zero.
    if th > 1:
        o_ref[1, 0 : th - 1, :] = ((x[1:, :] - x[:-1, :]) * w1[:-1, :]).astype(od)
    o_ref[1, th - 1 : th, :] = jnp.zeros((1, w_len), od)


def _fwg_kernel_tiled(x_ref, halo_ref, w_ref, o_ref, *, th, w_len, num_tiles, r_last):
    # Tiled variant: x_ref (TH, W) current row-tile of x[0]; halo_ref (8, W) is the
    # 8-row block starting at the first row of the next tile (clamped on the last tile).
    od = o_ref.dtype
    x = x_ref[...].astype(jnp.float32)        # (TH, W)
    w0 = w_ref[0].astype(jnp.float32)
    w1 = w_ref[1].astype(jnp.float32)

    # d/dx: forward diff along W; last column is zero.
    if w_len > 1:
        o_ref[0, :, 0 : w_len - 1] = ((x[:, 1:] - x[:, :-1]) * w0[:, :-1]).astype(od)
    o_ref[0, :, w_len - 1 : w_len] = jnp.zeros((th, 1), od)

    # d/dy: rows 0..TH-2 come from within the tile (TH >= 8 here).
    o_ref[1, 0 : th - 1, :] = ((x[1:, :] - x[:-1, :]) * w1[:-1, :]).astype(od)

    i = pl.program_id(0)

    # Seam row TH-1 needs the first row of the next tile (the 8-row halo).
    # Statically skipped on the last tile (its seam row is either the global last
    # row, handled below, or out of bounds and dropped by the bounded writeback).
    @pl.when(i < num_tiles - 1)
    def _():
        seam = (halo_ref[0:1, :].astype(jnp.float32) - x[th - 1 : th, :]) * w1[th - 1 : th, :]
        o_ref[1, th - 1 : th, :] = seam.astype(od)

    # The global last valid row has no forward neighbour -> gradient[1] is zero there.
    @pl.when(i == num_tiles - 1)
    def _():
        o_ref[1, r_last : r_last + 1, :] = jnp.zeros((1, w_len), od)


def forward_weighted_gradient(x, w, max_tile_rows=None):
    """x: (C, H, W), w: (2, H, W) -> (2, H, W) float32 (matches torch.FloatTensor)."""
    C, H, W = x.shape
    assert w.shape == (2, H, W), (x.shape, w.shape)
    out_dtype = jnp.float32
    itemsize = 4

    # --- generation-aware tile sizing (v7x: 64 MiB VMEM/TC; v5e/v6e: 128 MiB) ---
    vmem_cap = _vmem_capacity_bytes()
    vmem_limit = int(vmem_cap * 0.85)
    budget = min(int(vmem_cap * 0.55), 72 * 1024 * 1024)
    # double-buffered working set per tile row: x + 2*w + 2*out = 5 f32 planes x 2 buffers
    bytes_per_row = 10 * max(W, 1) * itemsize
    th_cap = max(8, (budget // bytes_per_row) // 8 * 8)
    if max_tile_rows is not None:
        th_cap = max(8, min(th_cap, (max_tile_rows // 8) * 8))

    if H <= 8:
        TH = H                                   # full-H block (allowed: equals full dim)
    else:
        TH = min(th_cap, (H // 8) * 8)           # multiple of 8, <= H
        if _cdiv(H, TH) < 2:
            # Prefer >= 2 grid steps (v7x megacore + DMA pipelining) when each
            # tile still moves >= ~1 MiB of HBM traffic.
            half = _round_up(_cdiv(H, 2), 8)
            if 5 * half * W * itemsize >= (1 << 20):
                TH = min(TH, half)

    num_tiles = _cdiv(H, TH)
    r_last = (H - 1) % TH                        # local index of the last valid image row

    x_spec = pl.BlockSpec((None, TH, W), lambda i: (0, i, 0))   # channel 0 only, squeezed
    w_spec = pl.BlockSpec((2, TH, W), lambda i: (0, i, 0))
    o_spec = pl.BlockSpec((2, TH, W), lambda i: (0, i, 0))

    common = dict(
        out_shape=jax.ShapeDtypeStruct((2, H, W), out_dtype),
        grid=(num_tiles,),
        out_specs=o_spec,
        compiler_params=pltpu.CompilerParams(
            dimension_semantics=("parallel",),
            vmem_limit_bytes=vmem_limit,
        ),
    )

    if num_tiles == 1:
        kernel = functools.partial(_fwg_kernel_single, th=TH, w_len=W)
        return pl.pallas_call(kernel, in_specs=[x_spec, w_spec], **common)(x, w)

    # 8-row halo: first row of the next tile; index clamped on the last tile
    # (its halo is never used for valid output).
    halo_step = TH // 8
    max_halo_blk = (H - 1) // 8
    halo_spec = pl.BlockSpec(
        (None, 8, W),
        lambda i: (0, jnp.minimum((i + 1) * halo_step, max_halo_blk), 0),
    )
    kernel = functools.partial(
        _fwg_kernel_tiled, th=TH, w_len=W, num_tiles=num_tiles, r_last=r_last
    )
    return pl.pallas_call(kernel, in_specs=[x_spec, halo_spec, w_spec], **common)(x, x, w)


def _reference(x, w):
    x0 = x[0].astype(jnp.float32)
    H, W = x0.shape
    g = jnp.zeros((2, H, W), jnp.float32)
    g = g.at[0, :, :-1].set(x0[:, 1:] - x0[:, :-1])
    g = g.at[1, :-1, :].set(x0[1:, :] - x0[:-1, :])
    return g * w.astype(jnp.float32)


if __name__ == "__main__":
    key = jax.random.PRNGKey(0)

    # Shapes: unaligned H/W with auto tiling, the original-module-like 16x16
    # (single-tile path), and forced small tiles to exercise the halo/seam path
    # with both divisible and partial last tiles.
    cases = [
        ((3, 20, 24), None),   # auto tiling (multi-tile, partial last tile)
        ((1, 16, 16), None),   # single-tile path
        ((2, 24, 128), 8),     # lane-aligned W, forced 3 tiles (halo/seam path)
        ((3, 20, 24), 8),      # forced 3 tiles with partial last tile
    ]
    for (shape, max_rows) in cases:
        C, H, W = shape
        key, kx, kw = jax.random.split(key, 3)
        x = jax.random.normal(kx, (C, H, W), dtype=jnp.float32)
        w = jax.random.normal(kw, (2, H, W), dtype=jnp.float32)

        out = forward_weighted_gradient(x, w, max_tile_rows=max_rows)
        out = jax.block_until_ready(out)

        ref = _reference(x, w)
        assert out.shape == (2, H, W), (out.shape, shape)
        assert jnp.allclose(out, ref, atol=1e-6, rtol=1e-6), (shape, max_rows)

    print("KERNEL_OK")
</pallas_src>

<mosaic_0001>
module attributes {stable_mosaic.version = 11 : i64} {
  func.func @_fwg_kernel_tiled(%arg0: i32, %arg1: memref<1x16x24xf32, #tpu.memory_space<vmem>>, %arg2: memref<1x8x24xf32, #tpu.memory_space<vmem>>, %arg3: memref<2x16x24xf32, #tpu.memory_space<vmem>>, %arg4: memref<2x16x24xf32, #tpu.memory_space<vmem>>) attributes {dimension_semantics = [#tpu.dimension_semantics<parallel>], iteration_bounds = array<i64: 2>, scalar_prefetch = 0 : i64, scratch_operands = 0 : i64, tpu.core_type = #tpu.core_type<tc>, window_params = [{transform_indices = @transform_0, window_bounds = array<i64: 1, 16, 24>}, {transform_indices = @transform_1, window_bounds = array<i64: 1, 8, 24>}, {transform_indices = @transform_2, window_bounds = array<i64: 2, 16, 24>}, {transform_indices = @transform_3, window_bounds = array<i64: 2, 16, 24>}]} {
    %c0 = arith.constant 0 : index
    %c0_0 = arith.constant 0 : index
    %c0_1 = arith.constant 0 : index
    %0 = vector.load %arg1[%c0, %c0_0, %c0_1] : memref<1x16x24xf32, #tpu.memory_space<vmem>>, vector<1x16x24xf32>
    %1 = vector.shape_cast %0 : vector<1x16x24xf32> to vector<16x24xf32>
    %c0_2 = arith.constant 0 : index
    %c0_3 = arith.constant 0 : index
    %c0_4 = arith.constant 0 : index
    %2 = vector.load %arg3[%c0_2, %c0_3, %c0_4] : memref<2x16x24xf32, #tpu.memory_space<vmem>>, vector<1x16x24xf32>
    %3 = vector.shape_cast %2 : vector<1x16x24xf32> to vector<16x24xf32>
    %c1 = arith.constant 1 : index
    %c0_5 = arith.constant 0 : index
    %c0_6 = arith.constant 0 : index
    %4 = vector.load %arg3[%c1, %c0_5, %c0_6] : memref<2x16x24xf32, #tpu.memory_space<vmem>>, vector<1x16x24xf32>
    %5 = vector.shape_cast %4 : vector<1x16x24xf32> to vector<16x24xf32>
    %6 = vector.extract_strided_slice %1 {offsets = [0, 1], sizes = [16, 23], strides = [1, 1]} : vector<16x24xf32> to vector<16x23xf32>
    %7 = vector.extract_strided_slice %1 {offsets = [0, 0], sizes = [16, 23], strides = [1, 1]} : vector<16x24xf32> to vector<16x23xf32>
    %8 = arith.subf %6, %7 : vector<16x23xf32>
    %9 = vector.extract_strided_slice %3 {offsets = [0, 0], sizes = [16, 23], strides = [1, 1]} : vector<16x24xf32> to vector<16x23xf32>
    %10 = arith.mulf %8, %9 : vector<16x23xf32>
    %c0_7 = arith.constant 0 : index
    %c0_8 = arith.constant 0 : index
    %c0_9 = arith.constant 0 : index
    %11 = vector.load %arg4[%c0_7, %c0_8, %c0_9] : memref<2x16x24xf32, #tpu.memory_space<vmem>>, vector<1x16x23xf32>
    %12 = vector.shape_cast %11 : vector<1x16x23xf32> to vector<16x23xf32>
    %13 = vector.shape_cast %10 : vector<16x23xf32> to vector<1x16x23xf32>
    tpu.vector_store %arg4[%c0_7, %c0_8, %c0_9], %13 {strides = array<i32>} : memref<2x16x24xf32, #tpu.memory_space<vmem>>, vector<1x16x23xf32>,
    %cst = arith.constant 0.000000e+00 : f32
    %14 = vector.broadcast %cst : f32 to vector<16x1xf32>
    %c0_10 = arith.constant 0 : index
    %c0_11 = arith.constant 0 : index
    %c23 = arith.constant 23 : index
    %15 = vector.load %arg4[%c0_10, %c0_11, %c23] : memref<2x16x24xf32, #tpu.memory_space<vmem>>, vector<1x16x1xf32>
    %16 = vector.shape_cast %15 : vector<1x16x1xf32> to vector<16x1xf32>
    %17 = vector.shape_cast %14 : vector<16x1xf32> to vector<1x16x1xf32>
    tpu.vector_store %arg4[%c0_10, %c0_11, %c23], %17 {strides = array<i32>} : memref<2x16x24xf32, #tpu.memory_space<vmem>>, vector<1x16x1xf32>,
    %18 = vector.extract_strided_slice %1 {offsets = [1, 0], sizes = [15, 24], strides = [1, 1]} : vector<16x24xf32> to vector<15x24xf32>
    %19 = vector.extract_strided_slice %1 {offsets = [0, 0], sizes = [15, 24], strides = [1, 1]} : vector<16x24xf32> to vector<15x24xf32>
    %20 = arith.subf %18, %19 : vector<15x24xf32>
    %21 = vector.extract_strided_slice %5 {offsets = [0, 0], sizes = [15, 24], strides = [1, 1]} : vector<16x24xf32> to vector<15x24xf32>
    %22 = arith.mulf %20, %21 : vector<15x24xf32>
    %c1_12 = arith.constant 1 : index
    %c0_13 = arith.constant 0 : index
    %c0_14 = arith.constant 0 : index
    %23 = vector.load %arg4[%c1_12, %c0_13, %c0_14] : memref<2x16x24xf32, #tpu.memory_space<vmem>>, vector<1x15x24xf32>
    %24 = vector.shape_cast %23 : vector<1x15x24xf32> to vector<15x24xf32>
    %25 = vector.shape_cast %22 : vector<15x24xf32> to vector<1x15x24xf32>
    tpu.vector_store %arg4[%c1_12, %c0_13, %c0_14], %25 {strides = array<i32>} : memref<2x16x24xf32, #tpu.memory_space<vmem>>, vector<1x15x24xf32>,
    %c1_i32 = arith.constant 1 : i32
    %26 = arith.cmpi slt, %arg0, %c1_i32 : i32
    %27 = arith.extui %26 : i1 to i32
    %c0_i32 = arith.constant 0 : i32
    %28 = arith.cmpi ne, %27, %c0_i32 : i32
    scf.if %28 {
      %c0_17 = arith.constant 0 : index
      %c0_18 = arith.constant 0 : index
      %c0_19 = arith.constant 0 : index
      %32 = vector.load %arg2[%c0_17, %c0_18, %c0_19] : memref<1x8x24xf32, #tpu.memory_space<vmem>>, vector<1x1x24xf32>
      %33 = vector.shape_cast %32 : vector<1x1x24xf32> to vector<1x24xf32>
      %34 = vector.extract_strided_slice %1 {offsets = [15, 0], sizes = [1, 24], strides = [1, 1]} : vector<16x24xf32> to vector<1x24xf32>
      %35 = arith.subf %33, %34 : vector<1x24xf32>
      %36 = vector.extract_strided_slice %5 {offsets = [15, 0], sizes = [1, 24], strides = [1, 1]} : vector<16x24xf32> to vector<1x24xf32>
      %37 = arith.mulf %35, %36 : vector<1x24xf32>
      %c1_20 = arith.constant 1 : index
      %c15 = arith.constant 15 : index
      %c0_21 = arith.constant 0 : index
      %38 = vector.load %arg4[%c1_20, %c15, %c0_21] : memref<2x16x24xf32, #tpu.memory_space<vmem>>, vector<1x1x24xf32>
      %39 = vector.shape_cast %38 : vector<1x1x24xf32> to vector<1x24xf32>
      %40 = vector.shape_cast %37 : vector<1x24xf32> to vector<1x1x24xf32>
      tpu.vector_store %arg4[%c1_20, %c15, %c0_21], %40 {strides = array<i32>} : memref<2x16x24xf32, #tpu.memory_space<vmem>>, vector<1x1x24xf32>,
    } else {
    }
    %c1_i32_15 = arith.constant 1 : i32
    %29 = arith.cmpi eq, %arg0, %c1_i32_15 : i32
    %30 = arith.extui %29 : i1 to i32
    %c0_i32_16 = arith.constant 0 : i32
    %31 = arith.cmpi ne, %30, %c0_i32_16 : i32
    scf.if %31 {
      %cst_17 = arith.constant 0.000000e+00 : f32
      %32 = vector.broadcast %cst_17 : f32 to vector<1x24xf32>
      %c1_18 = arith.constant 1 : index
      %c3 = arith.constant 3 : index
      %c0_19 = arith.constant 0 : index
      %33 = vector.load %arg4[%c1_18, %c3, %c0_19] : memref<2x16x24xf32, #tpu.memory_space<vmem>>, vector<1x1x24xf32>
      %34 = vector.shape_cast %33 : vector<1x1x24xf32> to vector<1x24xf32>
      %35 = vector.shape_cast %32 : vector<1x24xf32> to vector<1x1x24xf32>
      tpu.vector_store %arg4[%c1_18, %c3, %c0_19], %35 {strides = array<i32>} : memref<2x16x24xf32, #tpu.memory_space<vmem>>, vector<1x1x24xf32>,
    } else {
    }
    return
  }
  func.func @transform_0(%arg0: i32) -> (i32, i32, i32) {
    %c0_i32 = arith.constant 0 : i32
    %c0_i32_0 = arith.constant 0 : i32
    %c0_i32_1 = arith.constant 0 : i32
    return %c0_i32, %arg0, %c0_i32_0 : i32, i32, i32
  }
  func.func @transform_1(%arg0: i32) -> (i32, i32, i32) {
    %c1_i32 = arith.constant 1 : i32
    %0 = arith.addi %arg0, %c1_i32 : i32
    %c2_i32 = arith.constant 2 : i32
    %1 = arith.muli %0, %c2_i32 : i32
    %c2_i32_0 = arith.constant 2 : i32
    %2 = arith.minsi %1, %c2_i32_0 : i32
    %c0_i32 = arith.constant 0 : i32
    %c0_i32_1 = arith.constant 0 : i32
    %c0_i32_2 = arith.constant 0 : i32
    return %c0_i32, %2, %c0_i32_1 : i32, i32, i32
  }
  func.func @transform_2(%arg0: i32) -> (i32, i32, i32) {
    %c0_i32 = arith.constant 0 : i32
    %c0_i32_0 = arith.constant 0 : i32
    %c0_i32_1 = arith.constant 0 : i32
    return %c0_i32, %arg0, %c0_i32_0 : i32, i32, i32
  }
  func.func @transform_3(%arg0: i32) -> (i32, i32, i32) {
    %c0_i32 = arith.constant 0 : i32
    %c0_i32_0 = arith.constant 0 : i32
    %c0_i32_1 = arith.constant 0 : i32
    return %c0_i32, %arg0, %c0_i32_0 : i32, i32, i32
  }
}

</mosaic_0001>

<bundles_post_ra>
// kernel: tpu_custom_call.1
= control target key start
LH: loop header
LB: loop body
LE: loop exit
PB: predicated region body
PF: predicated region fallthrough
CT: control target
= control target key end

     0   :  { %8 = vsyncpa [#allocation3], 0  ;;  %s1533_s0 = inlined_call_operand.vmem [shape: f32[3,20,24], index: 0, kind: input, shape index: {}]   ;;  %s1534_s1 = inlined_call_operand.hbm [shape: f32[3,20,24], index: 1, kind: input, shape index: {}]   ;;  %s1535_s2 = inlined_call_operand.vmem [shape: f32[2,20,24], index: 2, kind: input, shape index: {}]   ;;  %s1536_s3 = inlined_call_operand.vmem [shape: f32[2,20,24], index: 3, kind: output, shape index: {}]  }
   0x1   :  { %10 = vsyncpa [#allocation3 + $0x1], 0  ;;  %s1278_s12 = smov 0   ;;  %s1280_s13 = smov 0  }
   0x2   :  { %s1282_s14 = smov 0   ;;  %s1284_s15 = smov 0  }
   0x3   :  { %s1286_s16 = smov 0   ;;  %s1288_s17 = smov 0  }
   0x4 LB: > { %s1307_s18 = sadd.s32 4294967295, %s1187_s17   ;;  %s1310_s19 = sadd.s32 1, %s1187_s17   ;;  %s1187_s17 = sphi %s1288_s17, %s1556_s17   ;;  %s1183_s16 = sphi %s1286_s16, %s1555_s16   ;;  %s1179_s15 = sphi %s1284_s15, %s1554_s15   ;;  %s1175_s14 = sphi %s1282_s14, %s1553_s14   ;;  %s1171_s13 = sphi %s1280_s13, %s1552_s13   ;;  %s1167_s12 = sphi %s1278_s12, %s1551_s12  }
   0x5   : > { %s849_s20 = sshll.u32 %s1187_s17, 1  ;;  %s57_s21 = sadd.s32 1, %s1183_s16 }
   0x6   : > { %s850_s22 = sadd.s32 2, %s849_s20  ;;  %p64_p0 = scmp.ne.s32.totalorder %s1183_s16, %s1179_s15 }
   0x7   : > { %p48_p1 = scmp.lt.s32.totalorder %s850_s22, 2  ;;  %s852_s23 = sadd.s32 2, %s850_s22 }
   0x8   : > { %p52_p2 = scmp.lt.s32.totalorder %s852_s23, 2  ;;  %p65_p3 = scmp.eq.s32.totalorder %s1187_s17, 0 }
   0x9   : > { %s1558_s22 = smov (!%p48_p1, %s850_s22), 2  ;;  %p70_p5 = scmp.ne.s32.totalorder %s1179_s15, %s1175_s14 }
   0xa   : > { %s1560_s23 = smov (!%p52_p2, %s852_s23), 2  ;;  %p1321_p4 = por %p65_p3, %p64_p0 }
   0xb   : > { %s54_s25 = ssub.s32 %s1558_s22, %s1560_s23  ;;  %p71_p6 = scmp.eq.s32.totalorder %s1307_s18, 0 }
   0xc   : > { %p55_p7 = scmp.eq.s32.totalorder %s54_s25, 0  ;;  %s80_s26 = ssub.s32 %s1187_s17, %s1310_s19 }
   0xd   : > { %p1329_p8 = por %p71_p6, %p70_p5  ;;  %p81_p9 = scmp.eq.s32.totalorder %s80_s26, 0 }
   0xe   : > { %s1334_s28 = scalar_select %p55_p7, %s1183_s16, %s57_s21  }
   0xf   : > { %s1539_s27 = scalar_select %p1329_p8, 1, 0 }
  0x10   : > { %s83_s29 = sadd.s32 1, %s1171_s13  ;;  %p90_p10 = scmp.ne.s32.totalorder %s1171_s13, %s1167_s12 }
  0x11   : > { %s1340_s30 = scalar_select %p81_p9, %s1171_s13, %s83_s29  }
  0x12   : > { %p1344_p11 = por %p90_p10, %p65_p3  ;;  %p120_p12 = scmp.eq.s32.totalorder %s1307_s18, 1 }
  0x13   : > { %p799_p0 = scmp.ge.s32.totalorder %s1187_s17, 2 }
  0x14   : > { %s1540_s4 = scalar_select %p1344_p11, 1, 0 }
  0x15   : > { %p1349_p13 = por %p120_p12, %p90_p10  ;;  %142 = sbr.rel (%p799_p0) target bundleno = 106 (0x6a), region = 16 }
  0x16   : > { %s163_s6 = sand.u32 (!%p799_p0), 1, %s1183_s16   ;;  %s802_s7 = sshll.u32 (!%p799_p0), %s1558_s22, 7 }
  0x17   : > { %s1541_s5 = scalar_select %p1349_p13, 1, 0 }
  0x18   : > { %s800_s8 = sshll.u32 (!%p799_p0), %s163_s6, 3  ;;  %s1358_s11 = scalar_lea.hbm (!%p799_p0), %s1534_s1, %s802_s7 }
  0x19   : > { %s167_s14 = scalar_lea.vmem (!%p799_p0), [#allocation2], %s800_s8  ;;  %s164_s23 = scalar_lea.sflag (!%p799_p0), [#allocation3], %s163_s6 }
  0x1a   : > { %s178_s21 = sshll.u32 (!%p799_p0), %s167_s14, 4  ;;  %s1045_s25 = scalar_lea.hbm (!%p799_p0), %s1358_s11, 128  ;;  %s179_s21 = int_to_ptr.vmem [resolvable:$true] %s178_s21 }
  0x1b   : > { %p1046_p1 = scmp.ne.s32.totalorder (!%p799_p0), %s1358_s11, %s1045_s25  ;;  %s1049_s29 = scalar_lea.hbm (!%p799_p0), %s1534_s1, 1152 }
  0x1c   : > { %p1050_p5 = scmp.lt.u32.totalorder %s1358_s11, %s1534_s1  ;;  %p1051_p6 = scmp.lt.u32.totalorder %s1049_s29, %s1045_s25 }
  0x1d   : > { %p1047_p2 = pnand %p1046_p1, %p1321_p4  ;;  %p1053_p9 = scmp.lt.u32.totalorder %s1045_s25, %s1358_s11 }
  0x1e   : > { %p1052_p7 = por %p1051_p6, %p1050_p5 }
  0x1f   : > { %p1048_p3 = pneg %p1047_p2 }
  0x20   : > { %p1054_p10 = por %p1053_p9, %p1052_p7 }
  0x22   : > { %p1055_p12 = pnand %p1054_p10, %p1048_p3 }
  0x24   : > { %1058 = shalt.err (!%p1055_p12)
}
  0x25   : > { %s1059_s6 = scalar_lea.vmem %s179_s21, 128  ;;  %s1253_s8 = smov [#allocation2]  }
  0x26   : > { %p1060_p0 = scmp.ne.s32.totalorder %s179_s21, %s1059_s6  ;;  %s1063_s10 = sshll.u32 %s1253_s8, 4  ;;  %s1064_s10 = int_to_ptr.vmem [resolvable:$false] %s1063_s10 }
  0x27   : > { %s1065_s14 = scalar_lea.vmem %s1064_s10, 256  ;;  %p1066_p13 = scmp.lt.s32.totalorder %s179_s21, %s1064_s10 }
  0x28   : > { %p1061_p1 = pnand %p1060_p0, %p1321_p4  ;;  %p1067_p8 = scmp.lt.s32.totalorder %s1065_s14, %s1059_s6 }
  0x2a   : > { %p1062_p2 = pneg %p1061_p1  ;;  %p1068_p11 = por %p1067_p8, %p1066_p13 }
  0x2c   : > { %p1069_p5 = pnand %p1068_p11, %p1062_p2 }
  0x2e   : > { %1072 = shalt.err (!%p1069_p5)
}
  0x2f   : > { %863 = dma.hbm_to_vmem [thread:$0]  (%p1321_p4), %s1358_s11, 128, %s179_s21, %s164_s23  }
  0x30   : > { %p1542_p3 = scmp.ne.s32.totalorder %s1540_s4, 0 }
  0x31   : > { %s186_s25 = sand.u32 (%p1542_p3), 1, %s1171_s13   ;;  %s190_s22 = ssub.s32 (%p1542_p3), 3, %s849_s20 }
  0x32   : > { %184 = sbr.rel (!%p1542_p3) target bundleno = 106 (0x6a), region = 28  ;;  %s803_s26 = sshll.u32 (%p1542_p3), %s186_s25, 5 }
  0x33   : > { %p191_p6 = scmp.lt.s32.totalorder (%p1542_p3), %s190_s22, 2  ;;  %s855_s29 = sshll.u32 (%p1542_p3), %s1187_s17, 4 }
  0x34   : > { %s1388_s24 = scalar_lea.vmem (%p1542_p3), %s1535_s2, %s855_s29   ;;  %s1391_s4 = scalar_lea.vmem (%p1542_p3), [#allocation4], %s803_s26  }
  0x39   : > { %s1562_s22 = smov (!%p191_p6, %s190_s22), 2 }
  0x3a   : > { %s805_s11 = sshll.u32 %s1562_s22, 8 }
  0x3b   : > { %p808_p4 = scmp.eq.s32.totalorder %s805_s11, 0 }
  0x3c   : > { %s1394_s21 = sshrl.u32 (!%p808_p4), %s1562_s22, 1 }
  0x3d   : > { %199 = sbr.rel (%p808_p4) target bundleno = 106 (0x6a), region = 32  ;;  %p809_p8 = scmp.le.s32.totalorder (!%p808_p4), %s1394_s21, 0 }
  0x44   : > { %708 = sbr.rel (%p809_p8) target bundleno = 85 (0x55), region = 207  ;;  %s1543_s20 = smov (!%p809_p8), %s1391_s4 }
  0x45   : > { %s1544_s23 = smov (!%p809_p8), %s1388_s24  ;;  %s1403_s6 = smov (!%p809_p8), 0  }
  0x46   : > { %s1201_s8 = smov (!%p809_p8), 0  }
  0x4b LB: >> { %v269_v0 = vld [vmem:[%s1195_s23] sm:$0xff]  ;;  %v271_v1 = vld [vmem:[%s1195_s23 + $0x8] sm:$0xff]  ;;  %v273_v2 = vld [vmem:[%s1195_s23 + $0x18] sm:$0xff]  ;;  %s277_s10 = sadd.s32 1, %s1199_s6  ;;  %s263_s8 = sadd.s32 1, %s1203_s8   ;;  %s1203_s8 = sphi %s1201_s8, %s263_s8   ;;  %s1199_s6 = sphi %s1403_s6, %s1545_s6   ;;  %s1195_s23 = sphi %s1544_s23, %s282_s23   ;;  %s1191_s20 = sphi %s1543_s20, %s283_s20  }
  0x4c   : >> { %270 = vst [vmem:[%s1191_s20] sm:$0xff] %v269_v0  ;;  %272 = vst [vmem:[%s1191_s20 + $0x8] sm:$0xff] %v271_v1  ;;  %v275_v3 = vld [vmem:[%s1195_s23 + $0x20] sm:$0xff]  ;;  %p278_p11 = scmp.ge.s32.totalorder %s277_s10, %s1394_s21  ;;  %p262_p13 = scmp.ge.s32.totalorder %s263_s8, %s1394_s21 }
  0x4d   : >> { %274 = vst [vmem:[%s1191_s20 + $0x10] sm:$0xff] %v273_v2  ;;  %276 = vst [vmem:[%s1191_s20 + $0x18] sm:$0xff] %v275_v3 }
  0x4e   : >> { %s1564_s10 = smov (%p278_p11, %s277_s10), 0  ;;  %265 = sbr.rel (!%p262_p13) target bundleno = 75 (0x4b), region = 213 }
  0x4f   : >> { %s810_s14 = sshll.u32 %s1564_s10, 4  ;;  %s1545_s6 = smov %s1564_s10 }
  0x50   : >> { %s282_s23 = scalar_lea.vmem %s1388_s24, %s810_s14   ;;  %s283_s20 = scalar_lea.vmem %s1391_s4, %s810_s14 [#allocation4]  }
  0x55 PF: > { %s1419_s25 = sand.u32 1, %s1562_s22   ;;  %s856_s26 = sshll.u32 %s1394_s21, 4 }
  0x56   : > { %s1423_s29 = scalar_lea.vmem %s1388_s24, %s856_s26   ;;  %s290_s9 = scalar_lea.vmem %s1391_s4, %s856_s26 [#allocation4]  }
  0x57   : > { %p815_p7 = scmp.le.s32.totalorder %s1419_s25, 0 }
  0x58   : > { %s1205_s7 = smov (!%p815_p7), %s290_s9   ;;  %s1209_s11 = smov (!%p815_p7), %s1423_s29  }
  0x59   : > { %722 = sbr.rel (%p815_p7) target bundleno = 106 (0x6a), region = 218  ;;  %s1213_s6 = smov (!%p815_p7), 0  }
  0x5a   : > { %s1217_s8 = smov (!%p815_p7), 0  }
  0x60 LB: >> { %v300_v4 = vld [vmem:[%s1211_s11] sm:$0xff]  ;;  %v302_v5 = vld [vmem:[%s1211_s11 + $0x18] sm:$0xff]  ;;  %s304_s22 = sadd.s32 1, %s1215_s6  ;;  %s294_s8 = sadd.s32 1, %s1219_s8   ;;  %s1219_s8 = sphi %s1217_s8, %s294_s8   ;;  %s1215_s6 = sphi %s1213_s6, %s1214_s6   ;;  %s1211_s11 = sphi %s1209_s11, %s309_s11   ;;  %s1207_s7 = sphi %s1205_s7, %s310_s7  }
  0x61   : >> { %301 = vst [vmem:[%s1207_s7] sm:$0xff] %v300_v4  ;;  %303 = vst [vmem:[%s1207_s7 + $0x10] sm:$0xff] %v302_v5  ;;  %p305_p9 = scmp.ge.s32.totalorder %s304_s22, %s1419_s25  ;;  %p293_p10 = scmp.ge.s32.totalorder %s294_s8, %s1419_s25 }
  0x63   : >> { %s1566_s22 = smov (%p305_p9, %s304_s22), 0  ;;  %296 = sbr.rel (!%p293_p10) target bundleno = 96 (0x60), region = 224 }
  0x64   : >> { %s816_s24 = sshll.u32 %s1566_s22, 3  ;;  %s1214_s6 = smov %s1566_s22  }
  0x65   : >> { %s309_s11 = scalar_lea.vmem %s1423_s29, %s816_s24   ;;  %s310_s7 = scalar_lea.vmem %s290_s9, %s816_s24 [#allocation4]  }
  0x6a PF: > { %p818_p12 = scmp.ge.s32.totalorder %s1187_s17, 1  ;;  %p315_p0 = scmp.lt.s32.totalorder %s1187_s17, 3 }
  0x6c   : > { %p316_p1 = pnand %p818_p12, %p315_p0 }
  0x6d   : > { %s321_s4 = sand.u32 (!%p316_p1), 1, %s1179_s15   ;;  %p1546_p2 = scmp.ne.s32.totalorder (!%p316_p1), %s1539_s27, 0 }
  0x6e   : > { %319 = sbr.rel (%p316_p1) target bundleno = 433 (0x1b1), region = 80  ;;  %s1434_s21 = sshll.u32 (!%p316_p1), %s321_s4, 3 }
  0x6f   : > { %s322_s20 = scalar_lea.sflag (!%p316_p1), [#allocation3], %s321_s4  ;;  %s325_s23 = scalar_lea.vmem (!%p316_p1), [#allocation2], %s1434_s21 }
  0x75   : > { %1162 = dma.done.wait (%p1546_p2), %s322_s20, 128  }
  0x76   : > { %1164 = vsyncadd (%p1546_p2), %s322_s20, 4294967168  ;;  %s1442_s10 = sshll.u32 %s1307_s18, 1  ;;  %s331_s17 = sand.u32 1, %s1167_s12   ;;  %vm436_vm0 = vcmask 1040384   ;;  %vm454_vm1 = vcmask 195585   ;;  %vm456_vm2 = vcmask 195584  }
  0x77   : > { %p372_p5 = scmp.lt.s32.totalorder %s1442_s10, 2  ;;  %s820_s14 = sshll.u32 %s331_s17, 5  ;;  %vm430_vm3 = vcmask 187392   ;;  %vm433_vm4 = vcmask 195768   ;;  %v1256_v31 = vmov 0.0  }
  0x78   : > { %s333_s11 = scalar_lea.vmem [#allocation4], %s820_s14  ;;  %s1254_s27 = smov 1  }
  0x79   : > { %s373_s25 = scalar_select %p372_p5, %s1442_s10, 2  ;;  %v397_v7 = vld [vmem:[%s333_s11] sm:$0xff]  ;;  %v824_v8 = vld [vmem:[%s333_s11 + $0x10] sm:$0xff]  ;;  %v825_v10 = vld [vmem:[%s333_s11 + $0x18] sm:$0xff] }
  0x7a   : > { %v446_v11 = vrot.slane %v824_v8, 7  ;;  %414 = vrot.lane.b32.xlu1 %v397_v7, %s1254_s27  ;;  %v447_v13 = vrot.slane %v825_v10, 7  ;;  %v398_v15 = vld [vmem:[%s333_s11 + $0x8] sm:$0xff]  ;;  %s1450_s12 = scalar_lea.vmem [#allocation5], %s820_s14   ;;  %s1255_s6 = smov 127  }
  0x7b   : > { %s823_s26 = sshll.u32 %s373_s25, 3  ;;  %p828_p3 = scmp.ge.s32.totalorder %s1307_s18, 1 }
  0x7c   : > { %s375_s7 = scalar_lea.vmem %s1533_s0, %s823_s26  ;;  %v448_v17 = vsel %vm436_vm0, %v446_v11, %v447_v13  ;;  %v462_v33 = vld [vmem:[%s325_s23] sm:$0x1] (!%p828_p3)  ;;  %vm467_vm5 = vcmask (!%p828_p3), 188416  }
  0x7d   : > { %v395_v6 = vld [vmem:[%s375_s7] sm:$0xff]  ;;  %v396_v12 = vld [vmem:[%s375_s7 + $0x8] sm:$0xff] }
  0x7e   : > { %404 = vrot.lane.b32.xlu0 %v395_v6, %s1254_s27  ;;  %v437_v9 = vrot.slane %v395_v6, 7  ;;  %v438_v14 = vrot.slane %v396_v12, 7  ;;  %416 = vrot.lane.b32.xlu1 %v398_v15, %s1254_s27 }
  0x80   : > { %v442_v16 = vsub.f32 %v395_v6, %v437_v9  ;;  %v439_v18 = vsel %vm436_vm0, %v437_v9, %v438_v14  ;;  %v464_v34 = vsub.f32 (!%p828_p3), %v462_v33, %v438_v14 }
  0x81   : > { %v443_v20 = vsub.f32 %v396_v12, %v439_v18 }
  0x82   : > { %v451_v19 = vmul.f32 %v446_v11, %v442_v16  ;;  %406 = vrot.lane.b32.xlu0 %v396_v12, %s1254_s27  ;;  %v466_v35 = vmul.f32 (!%p828_p3), %v464_v34, %v447_v13 }
  0x83   : > { %v452_v21 = vmul.f32 %v448_v17, %v443_v20 }
  0x84   : > { %826 = vst.msk [vmem:[%s1450_s12 + $0xf] sm:$0xfe] %vm454_vm1, %v451_v19 }
  0x85   : > { %827 = vst.msk [vmem:[%s1450_s12 + $0x17] sm:$0xff] %vm456_vm2, %v452_v21 }
  0x86   : > { %829 = vst.msk [vmem:[%s1450_s12 + $0x1f] sm:$0x1] (!%p828_p3), %vm467_vm5, %v466_v35 }
  0xec   : > { %v415_v23 = vpop.permute.xlu1 %414 }
  0xf0   : > { %v405_v22 = vpop.permute.xlu0 %404  ;;  %v417_v27 = vpop.permute.xlu1 %416 }
  0xf1   : > { %v410_v24 = vsub.f32 %v395_v6, %v405_v22 }
  0xf3   : > { %v420_v25 = vmul.f32 %v415_v23, %v410_v24 }
  0xf4   : > { %v407_v26 = vpop.permute.xlu0 %406 }
  0xf5   : > { %v411_v28 = vsub.f32 %v396_v12, %v407_v26  ;;  %424 = vrot.lane.b32.xlu0 %v420_v25, %s1255_s6 }
  0xf7   : > { %v421_v29 = vmul.f32 %v417_v27, %v411_v28 }
  0xf9   : > { %426 = vrot.lane.b32.xlu1 %v421_v29, %s1255_s6 }
 0x167   : > { %v425_v30 = vpop.permute.xlu0 %424  ;;  %461 = sbr.rel (%p828_p3) target bundleno = 366 (0x16e), region = 92 }
 0x168   : > { %431 = vst.msk [vmem:[%s1450_s12] sm:$0xff] %vm430_vm3, %v425_v30 }
 0x169   : > { %434 = vst.msk [vmem:[%s1450_s12] sm:$0xff] %vm433_vm4, %v1256_v31 }
 0x16b   : > { %v427_v32 = vpop.permute.xlu1 %426 }
 0x16c   : > { %432 = vst.msk [vmem:[%s1450_s12 + $0x8] sm:$0xff] %vm430_vm3, %v427_v32 }
 0x16d   : > { %435 = vst.msk [vmem:[%s1450_s12 + $0x8] sm:$0xff] %vm433_vm4, %v1256_v31 }
 0x16e PF: > { %p830_p6 = scmp.ne.s32.totalorder %s1307_s18, 1 }
 0x16f   : > { %vm473_vm6 = vcmask (!%p830_p6), 188416   ;;  %v1257_v36 = vmov (!%p830_p6), 0.0  }
 0x170   : > { %472 = sbr.rel (%p830_p6) target bundleno = 375 (0x177), region = 96  ;;  %831 = vst.msk [vmem:[%s1450_s12 + $0x13] sm:$0x1] (!%p830_p6), %vm473_vm6, %v1257_v36 }
 0x177 PF: > { %p1547_p4 = scmp.ne.s32.totalorder %s1541_s5, 0 }
 0x178   : > { %s483_s8 = ssub.s32 (%p1547_p4), 3, %s1442_s10  ;;  %s858_s22 = sshll.u32 (%p1547_p4), %s1307_s18, 4 }
 0x179   : > { %481 = sbr.rel (!%p1547_p4) target bundleno = 433 (0x1b1), region = 100  ;;  %p484_p8 = scmp.lt.s32.totalorder (%p1547_p4), %s483_s8, 2 }
 0x17a   : > { %s1471_s21 = scalar_lea.vmem (%p1547_p4), %s1536_s3, %s858_s22  }
 0x180   : > { %s1568_s8 = smov (!%p484_p8, %s483_s8), 2 }
 0x181   : > { %s834_s20 = sshll.u32 %s1568_s8, 8 }
 0x182   : > { %p837_p11 = scmp.eq.s32.totalorder %s834_s20, 0 }
 0x183   : > { %s1477_s23 = sshrl.u32 (!%p837_p11), %s1568_s8, 1 }
 0x184   : > { %492 = sbr.rel (%p837_p11) target bundleno = 433 (0x1b1), region = 104  ;;  %p838_p13 = scmp.le.s32.totalorder (!%p837_p11), %s1477_s23, 0 }
 0x18b   : > { %736 = sbr.rel (%p838_p13) target bundleno = 412 (0x19c), region = 229  ;;  %s1548_s18 = smov (!%p838_p13), %s1471_s21 }
 0x18c   : > { %s1549_s5 = smov (!%p838_p13), %s1450_s12  ;;  %s1486_s10 = smov (!%p838_p13), 0  }
 0x18d   : > { %s1233_s17 = smov (!%p838_p13), 0  }
 0x192 LB: >> { %v562_v37 = vld [vmem:[%s1227_s5] sm:$0xff]  ;;  %v564_v38 = vld [vmem:[%s1227_s5 + $0x8] sm:$0xff]  ;;  %v566_v39 = vld [vmem:[%s1227_s5 + $0x10] sm:$0xff]  ;;  %s570_s14 = sadd.s32 1, %s1231_s10  ;;  %s556_s17 = sadd.s32 1, %s1235_s17   ;;  %s1235_s17 = sphi %s1233_s17, %s556_s17   ;;  %s1231_s10 = sphi %s1486_s10, %s1550_s10   ;;  %s1227_s5 = sphi %s1549_s5, %s575_s5   ;;  %s1223_s18 = sphi %s1548_s18, %s576_s18  }
 0x193   : >> { %563 = vst [vmem:[%s1223_s18] sm:$0xff] %v562_v37  ;;  %565 = vst [vmem:[%s1223_s18 + $0x8] sm:$0xff] %v564_v38  ;;  %v568_v40 = vld [vmem:[%s1227_s5 + $0x18] sm:$0xff]  ;;  %p571_p7 = scmp.ge.s32.totalorder %s570_s14, %s1477_s23  ;;  %p555_p9 = scmp.ge.s32.totalorder %s556_s17, %s1477_s23 }
 0x194   : >> { %567 = vst [vmem:[%s1223_s18 + $0x18] sm:$0xff] %v566_v39  ;;  %569 = vst [vmem:[%s1223_s18 + $0x20] sm:$0xff] %v568_v40 }
 0x195   : >> { %s1570_s14 = smov (%p571_p7, %s570_s14), 0  ;;  %558 = sbr.rel (!%p555_p9) target bundleno = 402 (0x192), region = 235 }
 0x196   : >> { %s839_s25 = sshll.u32 %s1570_s14, 4  ;;  %s1550_s10 = smov %s1570_s14 }
 0x197   : >> { %s575_s5 = scalar_lea.vmem %s1450_s12, %s839_s25 [#allocation5]   ;;  %s576_s18 = scalar_lea.vmem %s1471_s21, %s839_s25  }
 0x19c PF: > { %s1502_s26 = sand.u32 1, %s1568_s8   ;;  %s859_s29 = sshll.u32 %s1477_s23, 4 }
 0x19d   : > { %s1506_s9 = scalar_lea.vmem %s1450_s12, %s859_s29 [#allocation5]   ;;  %s583_s7 = scalar_lea.vmem %s1471_s21, %s859_s29  }
 0x19e   : > { %p844_p10 = scmp.le.s32.totalorder %s1502_s26, 0 }
 0x19f   : > { %s1237_s11 = smov (!%p844_p10), %s583_s7   ;;  %s1241_s27 = smov (!%p844_p10), %s1506_s9  }
 0x1a0   : > { %750 = sbr.rel (%p844_p10) target bundleno = 433 (0x1b1), region = 240  ;;  %s1245_s6 = smov (!%p844_p10), 0  }
 0x1a1   : > { %s1249_s22 = smov (!%p844_p10), 0  }
 0x1a7 LB: >> { %v593_v41 = vld [vmem:[%s1243_s27] sm:$0xff]  ;;  %v595_v42 = vld [vmem:[%s1243_s27 + $0x10] sm:$0xff]  ;;  %s597_s12 = sadd.s32 1, %s1247_s6  ;;  %s587_s22 = sadd.s32 1, %s1251_s22   ;;  %s1251_s22 = sphi %s1249_s22, %s587_s22   ;;  %s1247_s6 = sphi %s1245_s6, %s1246_s6   ;;  %s1243_s27 = sphi %s1241_s27, %s602_s27   ;;  %s1239_s11 = sphi %s1237_s11, %s603_s11  }
 0x1a8   : >> { %594 = vst [vmem:[%s1239_s11] sm:$0xff] %v593_v41  ;;  %596 = vst [vmem:[%s1239_s11 + $0x18] sm:$0xff] %v595_v42  ;;  %p598_p12 = scmp.ge.s32.totalorder %s597_s12, %s1502_s26  ;;  %p586_p0 = scmp.ge.s32.totalorder %s587_s22, %s1502_s26 }
 0x1aa   : >> { %s1572_s12 = smov (%p598_p12, %s597_s12), 0  ;;  %589 = sbr.rel (!%p586_p0) target bundleno = 423 (0x1a7), region = 246 }
 0x1ab   : >> { %s845_s8 = sshll.u32 %s1572_s12, 3  ;;  %s1246_s6 = smov %s1572_s12  }
 0x1ac   : >> { %s602_s27 = scalar_lea.vmem %s1506_s9, %s845_s8 [#allocation5]   ;;  %s603_s11 = scalar_lea.vmem %s583_s7, %s845_s8  }
 0x1b1 PF: > { %p13_p1 = scmp.ge.s32.totalorder %s1310_s19, 4   ;;  %s1551_s12 = smov %s1171_s13 }
 0x1b2   : > { %s1552_s13 = smov %s1340_s30  ;;  %s1553_s14 = smov %s1179_s15 }
 0x1b3   : > { %s1554_s15 = smov %s1183_s16  ;;  %s1555_s16 = smov %s1334_s28 }
 0x1b4   : > { %s1556_s17 = smov %s1310_s19  ;;  %15 = sbr.rel (!%p13_p1) target bundleno = 4 (0x4), region = 257 }
 0x1bb   :  { %619 = vsyncpa [#allocation3], 1 }
 0x1bc   :  { %621 = vsyncpa [#allocation3 + $0x1], 1 }

</bundles_post_ra>
